<compile_context>
chip_gen: v7x
topology: tpu7x:2x2x1
jax: 0.10.0
libtpu: 0.0.40
codegen_flags: <defaults>
</compile_context>

<pallas_src>
import functools

import jax
import jax.numpy as jnp
from jax.experimental import pallas as pl
from jax.experimental.pallas import tpu as pltpu


def _transfg_loss_kernel(logits_ref, f_row_ref, f_colt_ref, lab_col_ref, lab_row_ref,
                         out_ref, *, inv_b, inv_b2, valid_b, tile_b, masked):
    # ---------------- cross-entropy for this batch row tile ----------------
    logits = logits_ref[...].astype(jnp.float32)                      # (tb, C)
    lab_col = lab_col_ref[...]                                        # (tb, 1) int32
    m = jnp.max(logits, axis=-1, keepdims=True)                       # (tb, 1)
    shifted = logits - m                                              # (tb, C)
    lse = jnp.log(jnp.sum(jnp.exp(shifted), axis=-1, keepdims=True))  # (tb, 1)
    cls = jax.lax.broadcasted_iota(jnp.int32, shifted.shape, 1)       # (tb, C)
    # select instead of one-hot * logits; the row-max m cancels out of
    # (lse - picked), so work directly on `shifted`.
    picked = jnp.sum(jnp.where(cls == lab_col, shifted, 0.0),
                     axis=-1, keepdims=True)                          # (tb, 1)
    ce_rows = lse - picked                                            # (tb, 1)

    # -------- contrastive: row tile vs. ALL columns (resident operand) ------
    # bf16 MXU operands (pre-normalized in the wrapper), f32 accumulation,
    # already in (M, K) @ (K, N) orientation.
    cos = jnp.dot(f_row_ref[...], f_colt_ref[...],
                  preferred_element_type=jnp.float32)                 # (tb, B_pad) f32
    same = lab_col == lab_row_ref[...]                                # (tb, B_pad) bool
    contrib = jnp.where(same, 1.0 - cos, jnp.maximum(cos - 0.4, 0.0))  # f32 (v5e-safe)

    if masked:  # compile-time flag: only emitted when the batch was padded
        i = pl.program_id(0)
        row_idx = i * tile_b + jax.lax.broadcasted_iota(
            jnp.int32, (contrib.shape[0], 1), 0)                      # (tb, 1)
        col_idx = jax.lax.broadcasted_iota(jnp.int32, contrib.shape, 1)
        row_ok = row_idx < valid_b
        contrib = jnp.where(jnp.logical_and(row_ok, col_idx < valid_b), contrib, 0.0)
        ce_rows = jnp.where(row_ok, ce_rows, 0.0)

    con_rows = jnp.sum(contrib, axis=-1, keepdims=True)               # (tb, 1) lane reduce
    per_row = ce_rows * inv_b + con_rows * inv_b2                     # (tb, 1)

    # Single cross-sublane reduce per row tile, lane-broadcast store.
    total = jnp.sum(per_row, keepdims=True)                           # (1, 1)
    out_ref[...] = jnp.broadcast_to(total, out_ref.shape).astype(out_ref.dtype)


def _pick_tiling(b):
    """Return (tile_b, padded_b)."""
    if b <= 256:
        return b, b                      # single tile == full (possibly ragged) batch
    for tb in (256, 128):
        if b % tb == 0:
            return tb, b
    tb = 128                             # ragged large batch: pad instead of one huge tile
    return tb, ((b + tb - 1) // tb) * tb


def _vmem_limit_bytes(tb, b_pad, c, d):
    per_step = tb * c * 4 + tb * d * 2 + tb * 4           # logits + f_row + lab_col tiles
    resident = d * b_pad * 2 + b_pad * 4                  # normalized featuresᵀ + label row
    temps = 4 * tb * b_pad * 4 + 2 * tb * c * 4           # cos/contrib/mask + softmax temps
    est = 2 * (per_step + resident) + temps + (2 << 20)   # double-buffering + headroom
    return int(min(max(est, 16 << 20), 64 << 20))         # stay under v7x physical VMEM


def transfg_loss(logits, features, target, smoothing_value=0):
    """pred = (logits (B, C), features (B, D)); target (B,) int labels."""
    # TODO(synk): smoothing_value != 0 (LabelSmoothLoss) not implemented; the module
    #             default is 0, which is the plain CrossEntropyLoss path.
    assert smoothing_value == 0
    B, C = logits.shape
    _, D = features.shape

    labels = target.reshape(-1).astype(jnp.int32)

    # --- pre-normalize once (f32 math), feed bf16 to the MXU ---
    f = features.astype(jnp.float32)
    f = f * jax.lax.rsqrt(jnp.maximum(jnp.sum(f * f, axis=-1, keepdims=True), 1e-24))
    f_row = f.astype(jnp.bfloat16)                         # (B, D)  MXU LHS

    tb, B_pad = _pick_tiling(B)
    n_t = B_pad // tb
    pad = B_pad - B
    logits_p = logits.astype(jnp.float32)
    if pad:
        logits_p = jnp.pad(logits_p, ((0, pad), (0, 0)))
        f_row = jnp.pad(f_row, ((0, pad), (0, 0)))         # zero rows -> cos = 0
        labels = jnp.pad(labels, (0, pad), constant_values=-1)
    f_colt = f_row.T                                       # (D, B_pad) resident MXU RHS
    lab_col = labels.reshape(B_pad, 1)
    lab_row = labels.reshape(1, B_pad)

    kernel = functools.partial(
        _transfg_loss_kernel,
        inv_b=float(1.0 / B), inv_b2=float(1.0 / (B * B)),
        valid_b=B, tile_b=tb, masked=bool(pad))

    grid_spec = pltpu.PrefetchScalarGridSpec(
        num_scalar_prefetch=0,
        grid=(n_t,),
        in_specs=[
            pl.BlockSpec((tb, C), lambda i: (i, 0)),       # logits, row tile
            pl.BlockSpec((tb, D), lambda i: (i, 0)),       # normalized bf16 features, row tile
            pl.BlockSpec((D, B_pad), lambda i: (0, 0)),    # normalized bf16 featuresᵀ, resident
            pl.BlockSpec((tb, 1), lambda i: (i, 0)),       # labels as column, row tile
            pl.BlockSpec((1, B_pad), lambda i: (0, 0)),    # labels as row, resident
        ],
        out_specs=pl.BlockSpec((1, 1, 128), lambda i: (i, 0, 0)),
    )

    partials = pl.pallas_call(
        kernel,
        out_shape=jax.ShapeDtypeStruct((n_t, 1, 128), jnp.float32),
        grid_spec=grid_spec,
        # NOTE: on v7x, pltpu.CORE_PARALLEL on this (naturally balanced) axis would
        # shard row tiles across the two TensorCores; kept as "parallel" here for
        # portability across v5e/v6e/v7x.
        compiler_params=pltpu.CompilerParams(
            dimension_semantics=("parallel",),
            vmem_limit_bytes=_vmem_limit_bytes(tb, B_pad, C, D),
        ),
    )(logits_p, f_row, f_colt, lab_col, lab_row)

    return jnp.sum(partials[:, 0, 0])


def _reference(logits, features, target):
    """Pure-JAX f32 reference mirroring the PyTorch module."""
    labels = target.reshape(-1)
    B = labels.shape[0]
    logits = logits.astype(jnp.float32)
    logp = jax.nn.log_softmax(logits, axis=-1)
    part = -jnp.sum(jnp.take_along_axis(logp, labels[:, None], axis=1)) / B

    f = features.astype(jnp.float32)
    f = f / jnp.maximum(jnp.linalg.norm(f, axis=-1, keepdims=True), 1e-12)
    cos = f @ f.T
    pos = (labels[:, None] == labels[None, :]).astype(jnp.float32)
    neg = 1.0 - pos
    loss = jnp.sum((1.0 - cos) * pos) + jnp.sum(jnp.maximum(cos - 0.4, 0.0) * neg)
    return part + loss / (B * B)


if __name__ == "__main__":
    key = jax.random.PRNGKey(0)
    k1, k2, k3 = jax.random.split(key, 3)

    B, C, D = 8, 16, 32
    logits = jax.random.normal(k1, (B, C), dtype=jnp.float32)
    features = jax.random.normal(k2, (B, D), dtype=jnp.float32)
    target = jax.random.randint(k3, (B,), 0, C, dtype=jnp.int32)

    loss = transfg_loss(logits, features, target)
    jax.block_until_ready(loss)

    ref = _reference(logits, features, target)
    # bf16 MXU operands for the cosine matrix => tolerance loosened vs f32 ref.
    assert jnp.allclose(loss, ref, rtol=2e-2, atol=2e-2), (loss, ref)

    print("KERNEL_OK")
</pallas_src>

<mosaic_0001>
module attributes {stable_mosaic.version = 11 : i64} {
  func.func @_transfg_loss_kernel(%arg0: i32, %arg1: memref<8x16xf32, #tpu.memory_space<vmem>>, %arg2: memref<8x32xbf16, #tpu.memory_space<vmem>>, %arg3: memref<32x8xbf16, #tpu.memory_space<vmem>>, %arg4: memref<8x1xi32, #tpu.memory_space<vmem>>, %arg5: memref<1x8xi32, #tpu.memory_space<vmem>>, %arg6: memref<1x1x128xf32, #tpu.memory_space<vmem>>) attributes {dimension_semantics = [#tpu.dimension_semantics<parallel>], iteration_bounds = array<i64: 1>, scalar_prefetch = 0 : i64, scratch_operands = 0 : i64, tpu.core_type = #tpu.core_type<tc>, window_params = [{transform_indices = @transform_0, window_bounds = array<i64: 8, 16>}, {transform_indices = @transform_1, window_bounds = array<i64: 8, 32>}, {pipeline_mode = #tpu.pipeline_mode<synchronous>, transform_indices = @transform_2, window_bounds = array<i64: 32, 8>}, {transform_indices = @transform_3, window_bounds = array<i64: 8, 1>}, {pipeline_mode = #tpu.pipeline_mode<synchronous>, transform_indices = @transform_4, window_bounds = array<i64: 1, 8>}, {transform_indices = @transform_5, window_bounds = array<i64: 1, 1, 128>}]} {
    %c0 = arith.constant 0 : index
    %c0_0 = arith.constant 0 : index
    %0 = vector.load %arg1[%c0, %c0_0] : memref<8x16xf32, #tpu.memory_space<vmem>>, vector<8x16xf32>
    %c0_1 = arith.constant 0 : index
    %c0_2 = arith.constant 0 : index
    %1 = vector.load %arg4[%c0_1, %c0_2] : memref<8x1xi32, #tpu.memory_space<vmem>>, vector<8x1xi32>
    %cst = arith.constant dense<0xFF800000> : vector<8xf32>
    %2 = vector.multi_reduction <maximumf>, %0, %cst [1] : vector<8x16xf32> to vector<8xf32>
    %3 = vector.shape_cast %2 : vector<8xf32> to vector<8x1xf32>
    %4 = vector.broadcast %3 : vector<8x1xf32> to vector<8x16xf32>
    %5 = arith.subf %0, %4 : vector<8x16xf32>
    %6 = math.exp %5 : vector<8x16xf32>
    %cst_3 = arith.constant dense<0.000000e+00> : vector<8xf32>
    %7 = vector.multi_reduction <add>, %6, %cst_3 [1] : vector<8x16xf32> to vector<8xf32>
    %8 = vector.shape_cast %7 : vector<8xf32> to vector<8x1xf32>
    %9 = math.log %8 : vector<8x1xf32>
    %10 = tpu.iota {dimensions = array<i32: 1>} : vector<8x16xi32>
    %11 = vector.broadcast %1 : vector<8x1xi32> to vector<8x16xi32>
    %12 = arith.cmpi eq, %10, %11 : vector<8x16xi32>
    %cst_4 = arith.constant 0.000000e+00 : f32
    %13 = vector.broadcast %cst_4 : f32 to vector<8x16xf32>
    %14 = arith.select %12, %5, %13 : vector<8x16xi1>, vector<8x16xf32>
    %cst_5 = arith.constant dense<0.000000e+00> : vector<8xf32>
    %15 = vector.multi_reduction <add>, %14, %cst_5 [1] : vector<8x16xf32> to vector<8xf32>
    %16 = vector.shape_cast %15 : vector<8xf32> to vector<8x1xf32>
    %17 = arith.subf %9, %16 : vector<8x1xf32>
    %c0_6 = arith.constant 0 : index
    %c0_7 = arith.constant 0 : index
    %18 = vector.load %arg2[%c0_6, %c0_7] : memref<8x32xbf16, #tpu.memory_space<vmem>>, vector<8x32xbf16>
    %c0_8 = arith.constant 0 : index
    %c0_9 = arith.constant 0 : index
    %19 = vector.load %arg3[%c0_8, %c0_9] : memref<32x8xbf16, #tpu.memory_space<vmem>>, vector<32x8xbf16>
    %cst_10 = arith.constant dense<0.000000e+00> : vector<8x8xf32>
    %20 = tpu.matmul %18, %19, %cst_10 {dimension_numbers = #tpu.dot_dimension_numbers<[1], [0], [0], [1], [0, 0, 1, 1], [], []>} : vector<8x32xbf16>, vector<32x8xbf16>, vector<8x8xf32> -> vector<8x8xf32>
    %c0_11 = arith.constant 0 : index
    %c0_12 = arith.constant 0 : index
    %21 = vector.load %arg5[%c0_11, %c0_12] : memref<1x8xi32, #tpu.memory_space<vmem>>, vector<1x8xi32>
    %22 = vector.broadcast %1 : vector<8x1xi32> to vector<8x8xi32>
    %23 = vector.broadcast %21 : vector<1x8xi32> to vector<8x8xi32>
    %24 = arith.cmpi eq, %22, %23 : vector<8x8xi32>
    %cst_13 = arith.constant 1.000000e+00 : f32
    %25 = vector.broadcast %cst_13 : f32 to vector<8x8xf32>
    %26 = arith.subf %25, %20 : vector<8x8xf32>
    %cst_14 = arith.constant 4.000000e-01 : f32
    %27 = vector.broadcast %cst_14 : f32 to vector<8x8xf32>
    %28 = arith.subf %20, %27 : vector<8x8xf32>
    %cst_15 = arith.constant 0.000000e+00 : f32
    %29 = vector.broadcast %cst_15 : f32 to vector<8x8xf32>
    %30 = arith.maximumf %28, %29 : vector<8x8xf32>
    %31 = arith.select %24, %26, %30 : vector<8x8xi1>, vector<8x8xf32>
    %cst_16 = arith.constant dense<0.000000e+00> : vector<8xf32>
    %32 = vector.multi_reduction <add>, %31, %cst_16 [1] : vector<8x8xf32> to vector<8xf32>
    %33 = vector.shape_cast %32 : vector<8xf32> to vector<8x1xf32>
    %cst_17 = arith.constant 1.250000e-01 : f32
    %34 = vector.broadcast %cst_17 : f32 to vector<8x1xf32>
    %35 = arith.mulf %17, %34 : vector<8x1xf32>
    %cst_18 = arith.constant 1.562500e-02 : f32
    %36 = vector.broadcast %cst_18 : f32 to vector<8x1xf32>
    %37 = arith.mulf %33, %36 : vector<8x1xf32>
    %38 = arith.addf %35, %37 : vector<8x1xf32>
    %39 = vector.shape_cast %38 : vector<8x1xf32> to vector<1x8x1xf32>
    %cst_19 = arith.constant dense<0.000000e+00> : vector<1xf32>
    %40 = vector.multi_reduction <add>, %39, %cst_19 [1, 2] : vector<1x8x1xf32> to vector<1xf32>
    %41 = vector.shape_cast %40 : vector<1xf32> to vector<1x1x1xf32>
    %42 = vector.extract %41[0, 0, 0] : f32 from vector<1x1x1xf32>
    %43 = vector.broadcast %42 : f32 to vector<1x1xf32>
    %44 = vector.shape_cast %43 : vector<1x1xf32> to vector<1x1x1xf32>
    %45 = vector.broadcast %44 : vector<1x1x1xf32> to vector<1x1x128xf32>
    %c0_20 = arith.constant 0 : index
    %c0_21 = arith.constant 0 : index
    %c0_22 = arith.constant 0 : index
    %46 = vector.load %arg6[%c0_20, %c0_21, %c0_22] : memref<1x1x128xf32, #tpu.memory_space<vmem>>, vector<1x1x128xf32>
    tpu.vector_store %arg6[%c0_20, %c0_21, %c0_22], %45 {strides = array<i32>} : memref<1x1x128xf32, #tpu.memory_space<vmem>>, vector<1x1x128xf32>,
    return
  }
  func.func @transform_0(%arg0: i32) -> (i32, i32) {
    %c0_i32 = arith.constant 0 : i32
    %c0_i32_0 = arith.constant 0 : i32
    return %arg0, %c0_i32 : i32, i32
  }
  func.func @transform_1(%arg0: i32) -> (i32, i32) {
    %c0_i32 = arith.constant 0 : i32
    %c0_i32_0 = arith.constant 0 : i32
    return %arg0, %c0_i32 : i32, i32
  }
  func.func @transform_2(%arg0: i32) -> (i32, i32) {
    %c0_i32 = arith.constant 0 : i32
    %c0_i32_0 = arith.constant 0 : i32
    %c0_i32_1 = arith.constant 0 : i32
    return %c0_i32, %c0_i32_0 : i32, i32
  }
  func.func @transform_3(%arg0: i32) -> (i32, i32) {
    %c0_i32 = arith.constant 0 : i32
    %c0_i32_0 = arith.constant 0 : i32
    return %arg0, %c0_i32 : i32, i32
  }
  func.func @transform_4(%arg0: i32) -> (i32, i32) {
    %c0_i32 = arith.constant 0 : i32
    %c0_i32_0 = arith.constant 0 : i32
    %c0_i32_1 = arith.constant 0 : i32
    return %c0_i32, %c0_i32_0 : i32, i32
  }
  func.func @transform_5(%arg0: i32) -> (i32, i32, i32) {
    %c0_i32 = arith.constant 0 : i32
    %c0_i32_0 = arith.constant 0 : i32
    %c0_i32_1 = arith.constant 0 : i32
    return %arg0, %c0_i32, %c0_i32_0 : i32, i32, i32
  }
}

</mosaic_0001>

<bundles_post_ra>
// kernel: tpu_custom_call.1
= control target key start
LH: loop header
LB: loop body
LE: loop exit
PB: predicated region body
PF: predicated region fallthrough
CT: control target
= control target key end

     0   :  { %v205_v1 = vmov 0.0   ;;  %vm206_vm0 = vmmov 0   ;;  %vm24_vm1 = vcmask 130048   ;;  %v207_v5 = vmov 0   ;;  %s272_s0 = inlined_call_operand.vmem [shape: f32[8,16], index: 0, kind: input, shape index: {}]   ;;  %s273_s1 = inlined_call_operand.vmem [shape: bf16[8,32], index: 1, kind: input, shape index: {}]   ;;  %s274_s2 = inlined_call_operand.vmem [shape: bf16[32,8], index: 2, kind: input, shape index: {}]   ;;  %s275_s3 = inlined_call_operand.vmem [shape: s32[8,1], index: 3, kind: input, shape index: {}]   ;;  %s276_s4 = inlined_call_operand.vmem [shape: s32[1,8], index: 4, kind: input, shape index: {}]   ;;  %s277_s5 = inlined_call_operand.hbm [shape: f32[1,1,128], index: 5, kind: output, shape index: {}]  }
   0x1   :  { %v175_v0 = vld [vmem:[%s274_s2] sm:$0xff]   ;;  %160 = vmatprep.subr.bf16.mxu0 %v205_v1  ;;  %v176_v2 = vld [vmem:[%s274_s2 + $0x8] sm:$0xff]   ;;  %164 = vmatprep.mubr.msk.bf16.mxu0 %vm206_vm0, %v205_v1 }
   0x2   :  { %161 = vmatpush3.bf16.msra.mxu0 %v175_v0  ;;  %v22_v3 = vld [vmem:[%s272_s0] sm:$0xff]  ;;  %174 = vset.pattern.permute.xlu0 %v207_v5 }
   0x3   :  { %162 = vmatprep.subr.bf16.mxu0 %v205_v1  ;;  %v25_v4 = vsel %vm24_vm1, %v22_v3, -inf }
   0x4   :  { %10 = vsyncpa [#allocation3], 0  ;;  %26 = vmax.xlane.f32.xlu0 %v25_v4  ;;  %v47_v6 = vld [vmem:[%s273_s1] sm:$0xf]  ;;  %vm64_vm2 = vcmask 261120   ;;  %v36_v11 = vlaneseq  ;;  %vm118_vm4 = vcmask 64512  }
   0x5   :  { %v23_v7 = vld [vmem:[%s275_s3] sm:$0xff]  ;;  %vm125_vm6 = vcmask 7168   ;;  %s208_s3 = smov [#allocation2]  }
   0x6   :  { %163 = vmatpush3.bf16.msra.mxu0 %v176_v2  ;;  %v37_v12 = vand.u32 127, %v36_v11  ;;  %v155_v19 = vld [vmem:[%s276_s4] ss:$0 sm:$0xff]  ;;  %s144_s4 = sshll.u32 %s208_s3, 4  ;;  %s145_s4 = int_to_ptr.vmem [resolvable:$true] %s144_s4 }
   0x7   :  { %s181_s28 = scalar_lea.vmem %s145_s4, 16  ;;  %s185_s29 = scalar_lea.vmem %s145_s4, 32 }
   0x8   :  { %p182_p0 = scmp.ne.s32.totalorder %s145_s4, %s181_s28  ;;  %p186_p1 = scmp.lt.s32.totalorder %s145_s4, %s145_s4 }
   0x9   :  { %165 = vmatmul.mubr.msk.bf16.vlgmr.msra.gmra.mrb[0].mxu0 %vm64_vm2, %v47_v6  ;;  %p187_p2 = scmp.lt.s32.totalorder %s185_s29, %s181_s28 }
   0xb   :  { %p188_p3 = por %p187_p2, %p186_p1 }
   0xd   :  { %p189_p4 = pnand %p188_p3, %p182_p0 }
  0x1a   :  { %39 = vperm.xlu0 %174, %v23_v7  }
  0x91   :  { %v27_v8 = vpop.xlane.xlu0 %26 }
  0x92   :  { %v28_v9 = vsub.f32 %v22_v3, %v27_v8 }
  0x94   :  { %v29_v10 = vmul.f32 1.442695, %v28_v9 }
  0x96   :  { %177 = vpow2.f32 %v29_v10 }
  0x99   :  { %v40_v13 = vpop.permute.xlu0 %39 }
  0x9a   :  { %vm41_vm3 = vcmp.eq.s32.totalorder %v37_v12, %v40_v13  ;;  %vm113_vm5 = vcmp.eq.s32.totalorder %v40_v13, %v155_v19 }
  0x9b   :  { %v42_v15 = vsel %vm41_vm3, %v28_v9, 0.0 }
  0x9c   :  { %v43_v17 = vsel %vm24_vm1, %v42_v15, 0.0 }
  0xa0   :  { %v178_v14 = vpop.eup %177 }
  0xa1   :  { %v31_v16 = vsel %vm24_vm1, %v178_v14, 0.0 }
  0xa2   :  { %32 = vadd.xlane.f32.xlu1 %v31_v16 }
  0xa6   :  { %44 = vadd.xlane.f32.xlu1 %v43_v17 }
  0xdc   :  { %v102_v18 = vpop.f32.mrb[0].mxu0 }
  0xdd   :  { %v156_v20 = vadd.f32 -0.4, %v102_v18  ;;  %v166_v21 = vpop.f32.mrb[1].mxu0  ;;  %v114_v23 = vsub.f32 1.0, %v102_v18 }
  0xde   :  { %v105_v22 = vpop.f32.mrb[2].mxu0 }
  0xdf   :  { %v116_v24 = vmax.f32 %v156_v20, 0.0  ;;  %v167_v25 = vpop.f32.mrb[3].mxu0 }
  0xe1   :  { %v117_v26 = vsel %vm113_vm5, %v114_v23, %v116_v24 }
  0xe2   :  { %v119_v27 = vsel %vm118_vm4, %v117_v26, 0.0 }
  0xe3   :  { %120 = vadd.xlane.f32.xlu1 %v119_v27 }
 0x12f   :  { %v33_v28 = vpop.xlane.xlu1 %32 }
 0x130   :  { %179 = vlog2.f32 %v33_v28 }
 0x133   :  { %v45_v31 = vpop.xlane.xlu1 %44 }
 0x13a   :  { %v180_v29 = vpop.eup %179 }
 0x13b   :  { %v35_v30 = vmul.f32 0.6931472, %v180_v29 }
 0x13d   :  { %v46_v32 = vsub.f32 %v35_v30, %v45_v31 }
 0x13f   :  { %v122_v34 = vmul.f32 0.125, %v46_v32 }
 0x170   :  { %v121_v33 = vpop.xlane.xlu1 %120 }
 0x171   :  { %v123_v35 = vmul.f32 0.015625, %v121_v33 }
 0x173   :  { %v124_v36 = vadd.f32 %v123_v35, %v122_v34 }
 0x175   :  { %v126_v37 = vsel %vm125_vm6, %v124_v36, 0.0 }
 0x176   :  { %127 = vadd.xlane.f32.xlu1 %v126_v37 }
 0x203   :  { %v128_v38 = vpop.xlane.xlu1 %127 }
 0x204   :  { %v129_v39 = vrot.slane %v128_v38, 4 }
 0x206   :  { %v130_v40 = vadd.f32 %v129_v39, %v128_v38 }
 0x208   :  { %v131_v41 = vrot.slane %v130_v40, 2 }
 0x20a   :  { %v132_v42 = vadd.f32 %v131_v41, %v130_v40 }
 0x20c   :  { %v133_v43 = vrot.slane %v132_v42, 1 }
 0x20e   :  { %v134_v44 = vadd.f32 %v133_v43, %v132_v42 }
 0x210   :  { %168 = vpush %v134_v44 }
 0x241   :  { %s169_s27 = spop %168 }
 0x242   :  { %v136_v45 = vstv %s169_s27 }
 0x243   :  { %137 = vst [vmem:[#allocation2] sm:$0x1] %v136_v45 }
 0x244   :  { %192 = shalt.err (!%p189_p4)
}
 0x245   :  { %s193_s7 = scalar_lea.hbm %s277_s5, 16 }
 0x246   :  { %p194_p5 = scmp.ne.s32.totalorder %s277_s5, %s193_s7  ;;  %p197_p6 = scmp.lt.u32.totalorder %s193_s7, %s277_s5 }
 0x248   :  { %p199_p7 = pnand %p197_p6, %p194_p5 }
 0x24a   :  { %202 = shalt.err (!%p199_p7)
}
 0x24b   :  { %147 = dma.vmem_to_hbm [thread:$0]  %s145_s4, 16, %s277_s5, [#allocation3]  }
 0x24c   :  { %203 = dma.done.wait [#allocation3], 16  }
 0x24d   :  { %204 = vsyncadd [#allocation3], 4294967280 }
 0x24e   :  { %151 = vsyncpa [#allocation3], 1 }

</bundles_post_ra>
